<compile_context>
chip_gen: v7x
topology: tpu7x:2x2x1
jax: 0.10.0
libtpu: 0.0.40
codegen_flags: <defaults>
</compile_context>

<pallas_src>
import functools

import jax
import jax.numpy as jnp
from jax.experimental import pallas as pl
from jax.experimental.pallas import tpu as pltpu


# ----------------------------------------------------------------------------
# helpers
# ----------------------------------------------------------------------------
def _vmem_spec():
    return pl.BlockSpec(memory_space=pltpu.MemorySpace.VMEM)


def _vmem_specs(n):
    return [_vmem_spec() for _ in range(n)]


def _cdiv(a, b):
    return -(-a // b)


# ----------------------------------------------------------------------------
# encoder kernels
# ----------------------------------------------------------------------------
def _linear_kernel(x_ref, w_ref, b_ref, o_ref):
    o_ref[...] = (jnp.dot(x_ref[...], w_ref[...],
                          preferred_element_type=jnp.float32) + b_ref[...])


def linear(x, w, b, row_tile=512):
    """Row-tiled Linear.  Grids over row blocks when rows divide row_tile."""
    n, fin = x.shape
    fout = w.shape[1]
    out_shape = jax.ShapeDtypeStruct((n, fout), jnp.float32)
    if n % row_tile == 0:
        return pl.pallas_call(
            _linear_kernel,
            grid=(n // row_tile,),
            in_specs=[pl.BlockSpec((row_tile, fin), lambda i: (i, 0)),
                      pl.BlockSpec((fin, fout), lambda i: (0, 0)),
                      pl.BlockSpec((1, fout), lambda i: (0, 0))],
            out_specs=pl.BlockSpec((row_tile, fout), lambda i: (i, 0)),
            out_shape=out_shape,
            compiler_params=pltpu.CompilerParams(
                dimension_semantics=("parallel",)),
        )(x, w, b)
    return pl.pallas_call(
        _linear_kernel,
        out_shape=out_shape,
        in_specs=_vmem_specs(3),
        out_specs=_vmem_spec(),
    )(x, w, b)


def _node_encoder_kernel(x_ref, pos_ref, wn_ref, bn_ref, wp_ref, bp_ref,
                         g_ref, b_ref, o_ref):
    # fused: h = LayerNorm(Linear(nfeat)); p = Linear(pos); out = [h || p]
    h = (jnp.dot(x_ref[...], wn_ref[...],
                 preferred_element_type=jnp.float32) + bn_ref[...])
    mu = jnp.mean(h, axis=-1, keepdims=True)
    var = jnp.mean((h - mu) ** 2, axis=-1, keepdims=True)
    h = (h - mu) * jax.lax.rsqrt(var + 1e-5) * g_ref[...] + b_ref[...]
    p = (jnp.dot(pos_ref[...], wp_ref[...],
                 preferred_element_type=jnp.float32) + bp_ref[...])
    o_ref[...] = jnp.concatenate([h, p], axis=1)      # single lane-dense store


def encode_nodes(nfeat, pos, node_p, pose_p, norm_p):
    n = nfeat.shape[0]
    d = node_p['w'].shape[1]
    return pl.pallas_call(
        _node_encoder_kernel,
        out_shape=jax.ShapeDtypeStruct((n, 2 * d), jnp.float32),
        in_specs=_vmem_specs(8),
        out_specs=_vmem_spec(),
    )(nfeat, pos, node_p['w'], node_p['b'], pose_p['w'], pose_p['b'],
      norm_p['g'], norm_p['b'])


# ----------------------------------------------------------------------------
# GatedGCN-LSPE layer kernel (one-hot MXU gather / scatter, edge-tile grid)
# ----------------------------------------------------------------------------
def _gated_layer_kernel(src_ref, dst_ref, dstt_ref, hp_ref, e_ref,
                        Wall_ref, ball_ref, B3w_ref, B3b_ref,
                        bnhs_ref, bnht_ref, bnes_ref, bnet_ref,
                        hp_out_ref, e_out_ref,
                        nproj_ref, acc_ref,
                        *, emb, tile_e, n_nodes):
    f32 = jnp.float32
    d = emb
    t = pl.program_id(0)
    last = pl.num_programs(0) - 1

    # ---- t == 0 : single fused lane-dense node projection + acc init --------
    # Wall column groups (each exactly 128 lanes when d == 32):
    #   [   0 : 4d] = [B1 |  0 |  0 |  0]   -> gathered by destination node i
    #   [ 4d : 8d ] = [ 0 | B2 | A2 | C2]   -> gathered by source node j
    #   [ 8d : 12d] = [A1 | C1 |  0 |  0]   -> node-local (finalize step)
    @pl.when(t == 0)
    def _():
        nproj_ref[...] = (jnp.dot(hp_ref[...], Wall_ref[...],
                                  preferred_element_type=f32) + ball_ref[...])
        acc_ref[...] = jnp.zeros_like(acc_ref)

    # ---- per-edge-tile phase: one-hot MXU gather -----------------------------
    src = src_ref[...]                               # [tile_e, 1] int32
    dst = dst_ref[...]                               # [tile_e, 1] int32
    # sentinel index == n_nodes never matches -> padded edges gather zeros.
    iota_e = jax.lax.broadcasted_iota(jnp.int32, (tile_e, n_nodes), 1)
    oh_src = (iota_e == src).astype(f32)             # [tile_e, N]
    oh_dst = (iota_e == dst).astype(f32)             # [tile_e, N]

    g = (jnp.dot(oh_dst, nproj_ref[:, 0:4 * d], preferred_element_type=f32) +
         jnp.dot(oh_src, nproj_ref[:, 4 * d:8 * d], preferred_element_type=f32))
    # g = [B1_i | B2_j | A2_j | C2_j]  (128 lanes)

    e_tile = e_ref[...]                              # [tile_e, D]
    b3e = (jnp.dot(e_tile, B3w_ref[...],
                   preferred_element_type=f32) + B3b_ref[...])
    e_hat = g[:, 0:d] + g[:, d:2 * d] + b3e
    # exact sigmoid with a single EUP push
    sigma = 0.5 * (jnp.tanh(0.5 * e_hat) + 1.0)

    # fused messages, 128-lane: [sigma | sigma*A2_j | sigma*C2_j | 0]
    msg = jnp.concatenate(
        [sigma, sigma * g[:, 2 * d:3 * d], sigma * g[:, 3 * d:4 * d],
         jnp.zeros_like(sigma)], axis=1)             # [tile_e, 128]

    # ---- scatter-add as plain matmul with transposed one-hot ----------------
    iota_n = jax.lax.broadcasted_iota(jnp.int32, (n_nodes, tile_e), 0)
    oh_dst_t = (iota_n == dstt_ref[...]).astype(f32)          # [N, tile_e]
    acc_ref[...] += jnp.dot(oh_dst_t, msg, preferred_element_type=f32)

    # edge update: e + ReLU(BN(e_hat))  (eval-mode BN folded to scale/shift)
    e_out_ref[...] = e_tile + jnp.maximum(
        e_hat * bnes_ref[...] + bnet_ref[...], 0.0)

    # ---- t == last : node-level eta normalization + updates ------------------
    @pl.when(t == last)
    def _():
        hp = hp_ref[...]
        acc = acc_ref[...]                 # [Σσ | Σσ·A2 | Σσ·C2 | 0]
        nloc = nproj_ref[:, 8 * d:12 * d]  # [A1 | C1 | 0 | 0]
        inv_den = 1.0 / (acc[:, 0:d] + 1e-6)          # exact division
        h_hat = nloc[:, 0:d] + acc[:, d:2 * d] * inv_den
        p_hat = nloc[:, d:2 * d] + acc[:, 2 * d:3 * d] * inv_den
        h_out = hp[:, 0:d] + jnp.maximum(
            h_hat * bnhs_ref[...] + bnht_ref[...], 0.0)
        p_out = hp[:, d:2 * d] + jnp.tanh(p_hat)
        hp_out_ref[...] = jnp.concatenate([h_out, p_out], axis=1)  # one store


def gated_gcn_lspe_layer(hp, e, src, dst, dst_t, lp, tile_e=512):
    """hp: packed [N, 2D] = [h || p]; e: [E_pad, D]; src/dst: [E_pad, 1] int32
    (padded edges carry sentinel index N); dst_t: [1, E_pad] int32."""
    n, two_d = hp.shape
    d = two_d // 2
    e_pad = e.shape[0]
    assert e_pad % tile_e == 0
    grid = (e_pad // tile_e,)

    kernel = functools.partial(_gated_layer_kernel,
                               emb=d, tile_e=tile_e, n_nodes=n)

    in_specs = [
        pl.BlockSpec((tile_e, 1), lambda t: (t, 0)),        # src (edge tile)
        pl.BlockSpec((tile_e, 1), lambda t: (t, 0)),        # dst (edge tile)
        pl.BlockSpec((1, tile_e), lambda t: (0, t)),        # dst (lane layout)
        pl.BlockSpec((n, two_d), lambda t: (0, 0)),         # hp (resident)
        pl.BlockSpec((tile_e, d), lambda t: (t, 0)),        # e tile
        pl.BlockSpec((two_d, 12 * d), lambda t: (0, 0)),    # fused W (aligned)
        pl.BlockSpec((1, 12 * d), lambda t: (0, 0)),        # fused b
        pl.BlockSpec((d, d), lambda t: (0, 0)),             # B3 w
        pl.BlockSpec((1, d), lambda t: (0, 0)),             # B3 b
        pl.BlockSpec((1, d), lambda t: (0, 0)),             # bnh scale
        pl.BlockSpec((1, d), lambda t: (0, 0)),             # bnh shift
        pl.BlockSpec((1, d), lambda t: (0, 0)),             # bne scale
        pl.BlockSpec((1, d), lambda t: (0, 0)),             # bne shift
    ]
    out_specs = (
        pl.BlockSpec((n, two_d), lambda t: (0, 0)),         # hp_out (resident)
        pl.BlockSpec((tile_e, d), lambda t: (t, 0)),        # e_out tile
    )
    scratch_shapes = [
        pltpu.VMEM((n, 12 * d), jnp.float32),   # fused node projection
        pltpu.VMEM((n, 4 * d), jnp.float32),    # acc [Σσ | ΣσA2 | ΣσC2 | 0]
    ]

    return pl.pallas_call(
        kernel,
        grid=grid,
        in_specs=in_specs,
        out_specs=out_specs,
        out_shape=(jax.ShapeDtypeStruct((n, two_d), jnp.float32),
                   jax.ShapeDtypeStruct((e_pad, d), jnp.float32)),
        scratch_shapes=scratch_shapes,
        compiler_params=pltpu.CompilerParams(
            dimension_semantics=("arbitrary",),             # scatter reduction
            vmem_limit_bytes=32 * 1024 * 1024),              # v7x-safe budget
    )(src, dst, dst_t, hp, e,
      lp['Wall'], lp['ball'], lp['B3w'], lp['B3b'],
      lp['bnh_s'], lp['bnh_t'], lp['bne_s'], lp['bne_t'])


# ----------------------------------------------------------------------------
# parameter init (deterministic, mirrors the nn.Module __init__ shapes)
# ----------------------------------------------------------------------------
def init_linear_params(key, fin, fout):
    kw, kb = jax.random.split(key)
    w = jax.random.normal(kw, (fin, fout), jnp.float32) / jnp.sqrt(float(fin))
    b = jax.random.normal(kb, (1, fout), jnp.float32) * 0.01
    return {'w': w, 'b': b}


def init_layer_params(key, d):
    ks = jax.random.split(key, 7)
    A1 = init_linear_params(ks[0], 2 * d, d)
    A2 = init_linear_params(ks[1], 2 * d, d)
    B1 = init_linear_params(ks[2], 2 * d, d)
    B2 = init_linear_params(ks[3], 2 * d, d)
    B3 = init_linear_params(ks[4], d, d)
    C1 = init_linear_params(ks[5], d, d)
    C2 = init_linear_params(ks[6], d, d)
    zdd = jnp.zeros((d, d), jnp.float32)
    z2dd = jnp.zeros((2 * d, d), jnp.float32)
    z1d = jnp.zeros((1, d), jnp.float32)
    C1w = jnp.concatenate([zdd, C1['w']], axis=0)   # C* act on p only
    C2w = jnp.concatenate([zdd, C2['w']], axis=0)
    # 128-lane-aligned fused column groups (see kernel docstring):
    #   [B1|0|0|0] | [0|B2|A2|C2] | [A1|C1|0|0]
    Wall = jnp.concatenate(
        [B1['w'], z2dd, z2dd, z2dd,
         z2dd, B2['w'], A2['w'], C2w,
         A1['w'], C1w, z2dd, z2dd], axis=1)          # [2d, 12d]
    ball = jnp.concatenate(
        [B1['b'], z1d, z1d, z1d,
         z1d, B2['b'], A2['b'], C2['b'],
         A1['b'], C1['b'], z1d, z1d], axis=1)        # [1, 12d]
    # BatchNorm1d eval mode at init: scale = gamma/sqrt(var+eps), shift = beta
    # (for a real checkpoint: shift = beta - gamma*running_mean/sqrt(var+eps))
    inv = jnp.float32(1.0 / (1.0 + 1e-5) ** 0.5)
    return {'Wall': Wall, 'ball': ball, 'B3w': B3['w'], 'B3b': B3['b'],
            'bnh_s': jnp.full((1, d), inv, jnp.float32),
            'bnh_t': jnp.zeros((1, d), jnp.float32),
            'bne_s': jnp.full((1, d), inv, jnp.float32),
            'bne_t': jnp.zeros((1, d), jnp.float32)}


def init_net_params(key, input_size, emb, edge_size, com_edge_size,
                    pose_size, num_layers):
    ks = jax.random.split(key, 7 + 3 * num_layers)
    params = {
        'p_node': init_linear_params(ks[0], input_size, emb),
        'p_edge': init_linear_params(ks[1], edge_size, emb),
        'p_pose': init_linear_params(ks[2], pose_size, emb),
        'l_node': init_linear_params(ks[3], input_size, emb),
        'l_edge': init_linear_params(ks[4], edge_size, emb),
        'l_pose': init_linear_params(ks[5], pose_size, emb),
        'c_edge': init_linear_params(ks[6], com_edge_size, emb),
        'p_norm': {'g': jnp.ones((1, emb), jnp.float32),
                   'b': jnp.zeros((1, emb), jnp.float32)},
        'l_norm': {'g': jnp.ones((1, emb), jnp.float32),
                   'b': jnp.zeros((1, emb), jnp.float32)},
    }
    params['p_blocks'] = [init_layer_params(ks[7 + i], emb)
                          for i in range(num_layers)]
    params['l_blocks'] = [init_layer_params(ks[7 + num_layers + i], emb)
                          for i in range(num_layers)]
    params['c_blocks'] = [init_layer_params(ks[7 + 2 * num_layers + i], emb)
                          for i in range(num_layers)]
    return params


# ----------------------------------------------------------------------------
# full network forward (glue in plain JAX, compute in Pallas kernels)
# ----------------------------------------------------------------------------
def gated_gcn_lspe_net_forward(params, gp, gl, gc, to_packed, tile_e=512):
    # encoders (node + pose + LayerNorm fused, producing packed [N, 2D])
    hp_pk = encode_nodes(gp['nfeat'], gp['pos'],
                         params['p_node'], params['p_pose'], params['p_norm'])
    hl_pk = encode_nodes(gl['nfeat'], gl['pos'],
                         params['l_node'], params['l_pose'], params['l_norm'])
    ep = linear(gp['efeat'], params['p_edge']['w'], params['p_edge']['b'],
                row_tile=tile_e)
    el = linear(gl['efeat'], params['l_edge']['w'], params['l_edge']['b'],
                row_tile=tile_e)
    ec = linear(gc['efeat'], params['c_edge']['w'], params['c_edge']['b'],
                row_tile=tile_e)

    d = hp_pk.shape[1] // 2
    n_prot = hp_pk.shape[0]

    hc_pk = None
    for li in range(len(params['p_blocks'])):
        hp_pk, ep = gated_gcn_lspe_layer(hp_pk, ep, gp['src'], gp['dst'],
                                         gp['dst_t'], params['p_blocks'][li],
                                         tile_e)
        hl_pk, el = gated_gcn_lspe_layer(hl_pk, el, gl['src'], gl['dst'],
                                         gl['dst_t'], params['l_blocks'][li],
                                         tile_e)
        # complex graph nodes in fixed [all protein | all ligand] layout:
        # one static concat (complex edges were remapped once on the host).
        hc_in = jnp.concatenate([hp_pk, hl_pk], axis=0)
        hc_pk, ec = gated_gcn_lspe_layer(hc_in, ec, gc['src'], gc['dst'],
                                         gc['dst_t'], params['c_blocks'][li],
                                         tile_e)
        # h comes from the complex layer; p stays from protein/ligand layers
        hp_pk = jnp.concatenate([hc_pk[:n_prot, 0:d], hp_pk[:, d:2 * d]], axis=1)
        hl_pk = jnp.concatenate([hc_pk[n_prot:, 0:d], hl_pk[:, d:2 * d]], axis=1)

    hp = hp_pk[:, 0:d]
    hl = hl_pk[:, 0:d]
    # final complex node features back in the original (interleaved) ordering
    hc = jnp.take(hc_pk[:, 0:d], to_packed, axis=0)
    return hp, hl, hc


# ----------------------------------------------------------------------------
# synthetic graph construction (int32 edge lists, padded with sentinel index)
# ----------------------------------------------------------------------------
def make_graph(key, node_sizes, edge_counts, node_feat_dim, edge_feat_dim,
               pose_dim=None):
    n_total = int(sum(node_sizes))
    kconn, knode, kedge, kpos = jax.random.split(key, 4)
    src_list, dst_list = [], []
    offset = 0
    kk = kconn
    for ns, ec in zip(node_sizes, edge_counts):
        kk, k1, k2 = jax.random.split(kk, 3)
        src_list.append(jax.random.randint(k1, (ec,), 0, ns) + offset)
        dst_list.append(jax.random.randint(k2, (ec,), 0, ns) + offset)
        offset += ns
    g = {
        'nfeat': jax.random.normal(knode, (n_total, node_feat_dim), jnp.float32),
        'efeat': jax.random.normal(kedge, (int(sum(edge_counts)), edge_feat_dim),
                                   jnp.float32),
        'src': jnp.concatenate(src_list).astype(jnp.int32),
        'dst': jnp.concatenate(dst_list).astype(jnp.int32),
        'n_nodes': n_total,
    }
    if pose_dim is not None:
        g['pos'] = jax.random.normal(kpos, (n_total, pose_dim), jnp.float32)
    return g


def pad_graph_edges(g, tile_e):
    """Pad edge arrays to a tile_e multiple.  Padded edges carry the sentinel
    node index n_nodes, which matches no one-hot column -> zero gather and
    zero scatter inside the kernel (no n_edges scalar needed)."""
    e_total = int(g['src'].shape[0])
    e_pad = tile_e * max(1, _cdiv(e_total, tile_e))
    n = g['n_nodes']
    pad = jnp.full((e_pad - e_total,), n, jnp.int32)
    src = jnp.concatenate([g['src'], pad])
    dst = jnp.concatenate([g['dst'], pad])
    g = dict(g)
    g['src'] = src.reshape(e_pad, 1)
    g['dst'] = dst.reshape(e_pad, 1)
    g['dst_t'] = dst.reshape(1, e_pad)
    g['efeat'] = jnp.concatenate(
        [g['efeat'],
         jnp.zeros((e_pad - e_total, g['efeat'].shape[1]), jnp.float32)], axis=0)
    return g


# ----------------------------------------------------------------------------
if __name__ == "__main__":
    input_size = 16
    embedding_size = 32
    edge_size = 8
    com_edge_size = 12
    pose_size = 8
    num_layers = 2
    TILE_E = 128            # small tile so the demo exercises multi-tile grids

    # batched graphs: 2 graphs per batch
    gp_sizes = [6, 5]       # protein nodes per graph
    gl_sizes = [4, 3]       # ligand nodes per graph
    gp_edges = [80, 70]     # 150 edges -> 2 edge tiles
    gl_edges = [40, 30]     # 70 edges  -> 1 edge tile
    gc_sizes = [p + l for p, l in zip(gp_sizes, gl_sizes)]
    gc_edges = [100, 60]    # 160 edges -> 2 edge tiles

    key = jax.random.PRNGKey(0)
    k_gp, k_gl, k_gc, k_params = jax.random.split(key, 4)

    gp = make_graph(k_gp, gp_sizes, gp_edges, input_size, edge_size,
                    pose_dim=pose_size)
    gl = make_graph(k_gl, gl_sizes, gl_edges, input_size, edge_size,
                    pose_dim=pose_size)
    gc = make_graph(k_gc, gc_sizes, gc_edges, 1, com_edge_size)

    # permutation: original interleaved complex ordering -> packed
    # [all protein | all ligand] ordering (edge remap done ONCE, then padded)
    n_prot, n_lig = int(sum(gp_sizes)), int(sum(gl_sizes))
    to_packed = []
    p_off, l_off = 0, 0
    for psz, lsz in zip(gp_sizes, gl_sizes):
        to_packed.extend(range(p_off, p_off + psz))
        to_packed.extend(range(n_prot + l_off, n_prot + l_off + lsz))
        p_off += psz
        l_off += lsz
    to_packed = jnp.asarray(to_packed, jnp.int32)
    gc['src'] = jnp.take(to_packed, gc['src'])
    gc['dst'] = jnp.take(to_packed, gc['dst'])

    gp = pad_graph_edges(gp, TILE_E)
    gl = pad_graph_edges(gl, TILE_E)
    gc = pad_graph_edges(gc, TILE_E)

    params = init_net_params(k_params, input_size, embedding_size, edge_size,
                             com_edge_size, pose_size, num_layers)

    hp, hl, hc = gated_gcn_lspe_net_forward(params, gp, gl, gc, to_packed,
                                            tile_e=TILE_E)
    jax.block_until_ready((hp, hl, hc))

    assert hp.shape == (n_prot, embedding_size)
    assert hl.shape == (n_lig, embedding_size)
    assert hc.shape == (n_prot + n_lig, embedding_size)
    assert bool(jnp.all(jnp.isfinite(hp)))
    assert bool(jnp.all(jnp.isfinite(hl)))
    assert bool(jnp.all(jnp.isfinite(hc)))
    print("KERNEL_OK")
</pallas_src>

<mosaic_0001>
module attributes {stable_mosaic.version = 11 : i64} {
  func.func @_node_encoder_kernel(%arg0: memref<11x16xf32, #tpu.memory_space<vmem>>, %arg1: memref<11x8xf32, #tpu.memory_space<vmem>>, %arg2: memref<16x32xf32, #tpu.memory_space<vmem>>, %arg3: memref<1x32xf32, #tpu.memory_space<vmem>>, %arg4: memref<8x32xf32, #tpu.memory_space<vmem>>, %arg5: memref<1x32xf32, #tpu.memory_space<vmem>>, %arg6: memref<1x32xf32, #tpu.memory_space<vmem>>, %arg7: memref<1x32xf32, #tpu.memory_space<vmem>>, %arg8: memref<11x64xf32, #tpu.memory_space<vmem>>) attributes {dimension_semantics = [], scalar_prefetch = 0 : i64, scratch_operands = 0 : i64, tpu.core_type = #tpu.core_type<tc>} {
    %c0 = arith.constant 0 : index
    %c0_0 = arith.constant 0 : index
    %0 = vector.load %arg0[%c0, %c0_0] : memref<11x16xf32, #tpu.memory_space<vmem>>, vector<11x16xf32>
    %c0_1 = arith.constant 0 : index
    %c0_2 = arith.constant 0 : index
    %1 = vector.load %arg2[%c0_1, %c0_2] : memref<16x32xf32, #tpu.memory_space<vmem>>, vector<16x32xf32>
    %cst = arith.constant dense<0.000000e+00> : vector<11x32xf32>
    %2 = tpu.matmul %0, %1, %cst {dimension_numbers = #tpu.dot_dimension_numbers<[1], [0], [0], [1], [0, 0, 1, 1], [], []>} : vector<11x16xf32>, vector<16x32xf32>, vector<11x32xf32> -> vector<11x32xf32>
    %c0_3 = arith.constant 0 : index
    %c0_4 = arith.constant 0 : index
    %3 = vector.load %arg3[%c0_3, %c0_4] : memref<1x32xf32, #tpu.memory_space<vmem>>, vector<1x32xf32>
    %4 = vector.broadcast %3 : vector<1x32xf32> to vector<11x32xf32>
    %5 = arith.addf %2, %4 : vector<11x32xf32>
    %cst_5 = arith.constant dense<0.000000e+00> : vector<11xf32>
    %6 = vector.multi_reduction <add>, %5, %cst_5 [1] : vector<11x32xf32> to vector<11xf32>
    %7 = vector.shape_cast %6 : vector<11xf32> to vector<11x1xf32>
    %cst_6 = arith.constant 3.200000e+01 : f32
    %8 = vector.broadcast %cst_6 : f32 to vector<11x1xf32>
    %9 = arith.divf %7, %8 : vector<11x1xf32>
    %10 = vector.broadcast %9 : vector<11x1xf32> to vector<11x32xf32>
    %11 = arith.subf %5, %10 : vector<11x32xf32>
    %12 = arith.mulf %11, %11 : vector<11x32xf32>
    %cst_7 = arith.constant dense<0.000000e+00> : vector<11xf32>
    %13 = vector.multi_reduction <add>, %12, %cst_7 [1] : vector<11x32xf32> to vector<11xf32>
    %14 = vector.shape_cast %13 : vector<11xf32> to vector<11x1xf32>
    %cst_8 = arith.constant 3.200000e+01 : f32
    %15 = vector.broadcast %cst_8 : f32 to vector<11x1xf32>
    %16 = arith.divf %14, %15 : vector<11x1xf32>
    %17 = vector.broadcast %9 : vector<11x1xf32> to vector<11x32xf32>
    %18 = arith.subf %5, %17 : vector<11x32xf32>
    %cst_9 = arith.constant 9.99999974E-6 : f32
    %19 = vector.broadcast %cst_9 : f32 to vector<11x1xf32>
    %20 = arith.addf %16, %19 : vector<11x1xf32>
    %21 = math.rsqrt %20 : vector<11x1xf32>
    %22 = vector.broadcast %21 : vector<11x1xf32> to vector<11x32xf32>
    %23 = arith.mulf %18, %22 : vector<11x32xf32>
    %c0_10 = arith.constant 0 : index
    %c0_11 = arith.constant 0 : index
    %24 = vector.load %arg6[%c0_10, %c0_11] : memref<1x32xf32, #tpu.memory_space<vmem>>, vector<1x32xf32>
    %25 = vector.broadcast %24 : vector<1x32xf32> to vector<11x32xf32>
    %26 = arith.mulf %23, %25 : vector<11x32xf32>
    %c0_12 = arith.constant 0 : index
    %c0_13 = arith.constant 0 : index
    %27 = vector.load %arg7[%c0_12, %c0_13] : memref<1x32xf32, #tpu.memory_space<vmem>>, vector<1x32xf32>
    %28 = vector.broadcast %27 : vector<1x32xf32> to vector<11x32xf32>
    %29 = arith.addf %26, %28 : vector<11x32xf32>
    %c0_14 = arith.constant 0 : index
    %c0_15 = arith.constant 0 : index
    %30 = vector.load %arg1[%c0_14, %c0_15] : memref<11x8xf32, #tpu.memory_space<vmem>>, vector<11x8xf32>
    %c0_16 = arith.constant 0 : index
    %c0_17 = arith.constant 0 : index
    %31 = vector.load %arg4[%c0_16, %c0_17] : memref<8x32xf32, #tpu.memory_space<vmem>>, vector<8x32xf32>
    %cst_18 = arith.constant dense<0.000000e+00> : vector<11x32xf32>
    %32 = tpu.matmul %30, %31, %cst_18 {dimension_numbers = #tpu.dot_dimension_numbers<[1], [0], [0], [1], [0, 0, 1, 1], [], []>} : vector<11x8xf32>, vector<8x32xf32>, vector<11x32xf32> -> vector<11x32xf32>
    %c0_19 = arith.constant 0 : index
    %c0_20 = arith.constant 0 : index
    %33 = vector.load %arg5[%c0_19, %c0_20] : memref<1x32xf32, #tpu.memory_space<vmem>>, vector<1x32xf32>
    %34 = vector.broadcast %33 : vector<1x32xf32> to vector<11x32xf32>
    %35 = arith.addf %32, %34 : vector<11x32xf32>
    %36 = tpu.concatenate %29, %35 in 1 : vector<11x32xf32>, vector<11x32xf32> -> vector<11x64xf32>
    %c0_21 = arith.constant 0 : index
    %c0_22 = arith.constant 0 : index
    %37 = vector.load %arg8[%c0_21, %c0_22] : memref<11x64xf32, #tpu.memory_space<vmem>>, vector<11x64xf32>
    tpu.vector_store %arg8[%c0_21, %c0_22], %36 {strides = array<i32>} : memref<11x64xf32, #tpu.memory_space<vmem>>, vector<11x64xf32>,
    return
  }
}

</mosaic_0001>

<bundles_post_ra>
// kernel: tpu_custom_call.1
= control target key start
LH: loop header
LB: loop body
LE: loop exit
PB: predicated region body
PF: predicated region fallthrough
CT: control target
= control target key end

     0   :  { %13 = vsyncpa [#allocation3], 0  ;;  %s510_s0 = inlined_call_operand.vmem [shape: f32[11,16], index: 0, kind: input, shape index: {}]   ;;  %s511_s1 = inlined_call_operand.vmem [shape: f32[11,8], index: 1, kind: input, shape index: {}]   ;;  %s512_s2 = inlined_call_operand.hbm [shape: f32[16,32], index: 2, kind: input, shape index: {}]   ;;  %s513_s3 = inlined_call_operand.vmem [shape: f32[1,32], index: 3, kind: input, shape index: {}]   ;;  %s514_s4 = inlined_call_operand.vmem [shape: f32[8,32], index: 4, kind: input, shape index: {}]   ;;  %s515_s5 = inlined_call_operand.vmem [shape: f32[1,32], index: 5, kind: input, shape index: {}]   ;;  %s516_s6 = inlined_call_operand.vmem [shape: f32[1,32], index: 6, kind: input, shape index: {}]   ;;  %s517_s7 = inlined_call_operand.vmem [shape: f32[1,32], index: 7, kind: input, shape index: {}]   ;;  %s518_s8 = inlined_call_operand.hbm [shape: f32[11,64], index: 8, kind: output, shape index: {}]  }
   0x1   :  { %14 = vsyncpa [#allocation4], 0  ;;  %s395_s27 = smov [#allocation2]   ;;  %s347_s9 = scalar_lea.hbm %s512_s2, 256 }
   0x2   :  { %s24_s28 = sshll.u32 %s395_s27, 4  ;;  %p348_p0 = scmp.ne.s32.totalorder %s512_s2, %s347_s9  ;;  %s25_s28 = int_to_ptr.vmem [resolvable:$true] %s24_s28 }
   0x3   :  { %p351_p1 = scmp.lt.u32.totalorder %s347_s9, %s512_s2 }
   0x5   :  { %p353_p2 = pnand %p351_p1, %p348_p0 }
   0x7   :  { %356 = shalt.err (!%p353_p2)
}
   0x8   :  { %s357_s14 = scalar_lea.vmem %s25_s28, 256  ;;  %p362_p4 = scmp.lt.s32.totalorder %s25_s28, %s25_s28 }
   0x9   :  { %p358_p3 = scmp.ne.s32.totalorder %s25_s28, %s357_s14  ;;  %p363_p5 = scmp.lt.s32.totalorder %s357_s14, %s357_s14 }
   0xb   :  { %p364_p6 = por %p363_p5, %p362_p4 }
   0xd   :  { %p365_p7 = pnand %p364_p6, %p358_p3 }
   0xf   :  { %368 = shalt.err (!%p365_p7)
}
  0x10   :  { %s396_s15 = smov 128   ;;  %s397_s16 = smov 8  }
  0x11   :  { %30 = dma.hbm_to_vmem [thread:$0]  %s512_s2, 256, %s25_s28, [#allocation3], %s396_s15, %s396_s15, %s397_s16  }
  0x12   :  { %391 = dma.done.wait [#allocation3], 256  }
  0x13   :  { %392 = vsyncadd [#allocation3], 4294967040  ;;  %vm55_vm0 = vcmask 130048   ;;  %vm194_vm1 = vcmask 64512   ;;  %v46_v0 = vld [vmem:[#allocation2] sm:$0xff]  ;;  %v47_v1 = vld [vmem:[#allocation2 + $0x8] sm:$0xff] }
  0x14   :  { %v44_v2 = vld [vmem:[%s510_s0] sm:$0xff]  ;;  %v334_v3 = vpack.c.bf16 %v47_v1, %v46_v0  ;;  %v185_v6 = vld [vmem:[%s511_s1 + $0x8] sm:$0x7]  ;;  %vm137_vm2 = vcmask 261120   ;;  %vm141_vm3 = vcmask 256000   ;;  %vm288_vm4 = vcmask 518144  }
  0x15   :  { %326 = vmatprep.mubr.msk.f32.mxu0 %vm55_vm0, %v44_v2  ;;  %v186_v4 = vld [vmem:[%s514_s4] sm:$0xff]  ;;  %v45_v7 = vld [vmem:[%s510_s0 + $0x8] sm:$0x7]  ;;  %s399_s10 = smov [#allocation5]   ;;  %vm286_vm5 = vcmask 523264  }
  0x16   :  { %v184_v5 = vld [vmem:[%s511_s1] sm:$0xff]  ;;  %329 = vmatprep.subr.mxu1 %v186_v4  ;;  %335 = vmatprep.subr.bf16.mxu0 %v334_v3  ;;  %s295_s11 = sshll.u32 %s399_s10, 4  ;;  %s296_s11 = int_to_ptr.vmem [resolvable:$true] %s295_s11 }
  0x17   :  { %331 = vmatprep.mubr.msk.f32.mxu1 %vm194_vm1, %v184_v5  ;;  %330 = vmatpush3.msra.mxu1 %v186_v4  ;;  %v307_v8 = vld [vmem:[%s513_s3] ss:$0 sm:$0xff]  ;;  %s398_s3 = smov 32   ;;  %p374_p9 = scmp.lt.s32.totalorder %s296_s11, %s296_s11 }
  0x18   :  { %337 = vmatpush3.bf16.msra.mxu0 %v334_v3  ;;  %332 = vmatmul.mubr.msk.f32.vlgmr.msra.gmra.mrb[0].mxu1 %vm194_vm1, %v185_v6  ;;  %v312_v16 = vld [vmem:[%s515_s5] ss:$0 sm:$0xff] }
  0x19   :  { %v310_v37 = vld [vmem:[%s516_s6] ss:$0 sm:$0xff]  ;;  %s369_s6 = scalar_lea.vmem %s296_s11, 256 }
  0x1a   :  { %v311_v39 = vld [vmem:[%s517_s7] ss:$0 sm:$0xff]  ;;  %p370_p8 = scmp.ne.s32.totalorder %s296_s11, %s369_s6  ;;  %p375_p10 = scmp.lt.s32.totalorder %s369_s6, %s369_s6 }
  0x1b   :  { %327 = vmatmul.mubr.msk.f32.vlgmr.msra.gmra.mrb[0].mxu0 %vm55_vm0, %v45_v7 }
  0x1c   :  { %p376_p11 = por %p375_p10, %p374_p9 }
  0x1e   :  { %p377_p12 = pnand %p376_p11, %p370_p8 }
  0xeb   :  { %v333_v15 = vpop.f32.mrb[0].mxu1 }
  0xec   :  { %v273_v17 = vadd.f32 %v333_v15, %v312_v16  ;;  %v267_v18 = vpop.f32.mrb[1].mxu1 }
  0xed   :  { %v268_v19 = vadd.f32 %v312_v16, %v267_v18 }
  0xee   :  { %v328_v9 = vpop.f32.mrb[0].mxu0 }
  0xef   :  { %v128_v10 = vpop.f32.mrb[1].mxu0  ;;  %v134_v12 = vadd.f32 %v328_v9, %v307_v8 }
  0xf0   :  { %v129_v11 = vadd.f32 %v307_v8, %v128_v10 }
  0xf1   :  { %v142_v14 = vsel %vm141_vm3, %v134_v12, 0.0 }
  0xf2   :  { %v138_v13 = vsel %vm137_vm2, %v129_v11, 0.0 }
  0xf3   :  { %139 = vadd.xlane.f32.xlu0 %v138_v13 }
  0xf7   :  { %143 = vadd.xlane.f32.xlu0 %v142_v14 }
 0x10d   :  { %278 = vrot.lane.b32.xlu0 %v268_v19, %s398_s3 }
 0x180   :  { %v140_v20 = vpop.xlane.xlu0 %139 }
 0x181   :  { %v146_v21 = vmul.f32 0.03125, %v140_v20 }
 0x183   :  { %v148_v24 = vsub.f32 %v129_v11, %v146_v21 }
 0x184   :  { %v144_v22 = vpop.xlane.xlu0 %143 }
 0x185   :  { %v147_v23 = vmul.f32 0.03125, %v144_v22  ;;  %v150_v28 = vmul.f32 %v148_v24, %v148_v24 }
 0x187   :  { %v149_v25 = vsub.f32 %v134_v12, %v147_v23  ;;  %v152_v29 = vsel %vm137_vm2, %v150_v28, 0.0 }
 0x188   :  { %v279_v47 = vpop.permute.xlu0 %278 }
 0x189   :  { %v151_v26 = vmul.f32 %v149_v25, %v149_v25 }
 0x18b   :  { %v155_v27 = vsel %vm141_vm3, %v151_v26, 0.0 }
 0x18c   :  { %156 = vadd.xlane.f32.xlu1 %v155_v27 }
 0x190   :  { %153 = vadd.xlane.f32.xlu1 %v152_v29 }
 0x1a1   :  { %280 = vrot.lane.b32.xlu1 %v273_v17, %s398_s3 }
 0x219   :  { %v157_v30 = vpop.xlane.xlu1 %156 }
 0x21a   :  { %v159_v31 = vmul.f32 0.03125, %v157_v30 }
 0x21c   :  { %v161_v32 = vadd.f32 1e-05, %v159_v31 }
 0x21d   :  { %v154_v33 = vpop.xlane.xlu1 %153 }
 0x21e   :  { %343 = vrsqrt.f32 %v161_v32  ;;  %v158_v34 = vmul.f32 0.03125, %v154_v33 }
 0x220   :  { %v160_v35 = vadd.f32 1e-05, %v158_v34 }
 0x221   :  { %v281_v42 = vpop.permute.xlu1 %280 }
 0x222   :  { %345 = vrsqrt.f32 %v160_v35 }
 0x228   :  { %v344_v36 = vpop.eup %343 }
 0x229   :  { %v165_v38 = vmul.f32 %v344_v36, %v149_v25 }
 0x22b   :  { %v174_v40 = vmul.f32 %v310_v37, %v165_v38 }
 0x22c   :  { %v346_v41 = vpop.eup %345 }
 0x22d   :  { %v183_v43 = vadd.f32 %v311_v39, %v174_v40  ;;  %v164_v44 = vmul.f32 %v346_v41, %v148_v24 }
 0x22f   :  { %v285_v45 = vsel %vm137_vm2, %v183_v43, %v281_v42  ;;  %v173_v46 = vmul.f32 %v310_v37, %v164_v44 }
 0x230   :  { %289 = vst.msk [vmem:[#allocation5 + $0x8] sm:$0x7] %vm288_vm4, %v285_v45 }
 0x231   :  { %v182_v48 = vadd.f32 %v311_v39, %v173_v46 }
 0x233   :  { %v284_v49 = vsel %vm137_vm2, %v182_v48, %v279_v47 }
 0x234   :  { %287 = vst.msk [vmem:[#allocation5] sm:$0xff] %vm286_vm5, %v284_v49 }
 0x235   :  { %380 = shalt.err (!%p377_p12)
}
 0x236   :  { %s381_s13 = scalar_lea.hbm %s518_s8, 256 }
 0x237   :  { %p382_p13 = scmp.ne.s32.totalorder %s518_s8, %s381_s13  ;;  %p385_p0 = scmp.lt.u32.totalorder %s381_s13, %s518_s8 }
 0x239   :  { %p387_p1 = pnand %p385_p0, %p382_p13 }
 0x23b   :  { %390 = shalt.err (!%p387_p1)
}
 0x23c   :  { %301 = dma.vmem_to_hbm [thread:$0]  %s296_s11, 256, %s518_s8, [#allocation4], %s396_s15, %s396_s15, %s397_s16  }
 0x23d   :  { %393 = dma.done.wait [#allocation4], 256  }
 0x23e   :  { %394 = vsyncadd [#allocation4], 4294967040 }
 0x23f   :  { %305 = vsyncpa [#allocation3], 1 }
 0x240   :  { %306 = vsyncpa [#allocation4], 1 }

</bundles_post_ra>
